<compile_context>
chip_gen: v7x
topology: tpu7x:2x2x1
jax: 0.10.0
libtpu: 0.0.40
codegen_flags: <defaults>
</compile_context>

<pallas_src>
import jax
import jax.numpy as jnp
from jax.experimental import pallas as pl
from jax.experimental.pallas import tpu as pltpu


# ----------------------------------------------------------------------------
# Pallas kernel: fused 4-layer MLP in feature-major (H, T) layout.
# ----------------------------------------------------------------------------
def _pinn_mlp_kernel(x_ref, y_ref, wmm_ref, cols_ref, b3_ref, uv_ref):
    """cols_ref (H, 8) columns:
         0: b0 (coor_shift folded)   1: b1            2: b2
         3: layer-0 x-weights        4: layer-0 y-weights
         5: output u-weights         6: output v-weights      7: zero pad
       wmm_ref (2H, H): rows [0:H) = W1^T, rows [H:2H) = W2^T.
       b3_ref  (2, 1):  output-layer bias (u, v)."""
    x_row = x_ref[...]                       # (1, T)
    y_row = y_ref[...]                       # (1, T)
    cols = cols_ref[...]                     # (H, 8)
    wmm = wmm_ref[...]                       # (2H, H)
    H = cols.shape[0]

    b0, b1, b2 = cols[:, 0:1], cols[:, 1:2], cols[:, 2:3]
    w0x, w0y = cols[:, 3:4], cols[:, 4:5]
    w3u, w3v = cols[:, 5:6], cols[:, 6:7]

    # Layer 0: the K=2 "matmul" as two VPU broadcast FMAs (MXU stays idle).
    h = jnp.tanh(w0x * x_row + w0y * y_row + b0)                       # (H, T)

    # Hidden layers: (H,H) @ (H,T) on the MXU; batch fills the lane dim.
    h = jnp.tanh(jnp.dot(wmm[0:H, :], h,
                         preferred_element_type=jnp.float32) + b1)
    h = jnp.tanh(jnp.dot(wmm[H:2 * H, :], h,
                         preferred_element_type=jnp.float32) + b2)
    # NOTE: the tanh chain (3*H transcendentals / point) is the binding unit
    # (single EUP slot); MXU / VPU / XLU / DMA all have slack here.

    # Output layer (2,H)@(H,T) as VPU broadcast-multiplies + XLU sublane
    # reductions — keeps the M=2 MXU fill+drain off the step epilogue.
    u = jnp.sum(w3u * h, axis=0, keepdims=True)                        # (1, T)
    v = jnp.sum(w3v * h, axis=0, keepdims=True)                        # (1, T)
    uv_ref[...] = jnp.concatenate([u, v], axis=0) + b3_ref[...]        # (2, T)


# ----------------------------------------------------------------------------
# Host-side helpers
# ----------------------------------------------------------------------------
def _round_up(a, b):
    return ((a + b - 1) // b) * b


def _cdiv(a, b):
    return -(-a // b)


def _num_tensorcores():
    """Best-effort TensorCores-per-device (megacore) detection; 1 is always a
    safe (merely conservative) answer."""
    try:
        info = pltpu.get_tpu_info()
        for attr in ("num_cores", "num_tensorcores", "tensorcores_per_chip",
                     "cores_per_chip", "core_count"):
            n = getattr(info, attr, None)
            if isinstance(n, int) and n > 0:
                return n
    except Exception:
        pass
    try:
        kind = jax.devices()[0].device_kind.lower()
        if ("v4" in kind) or ("v5p" in kind) or ("v7" in kind) or ("tpu7" in kind):
            return 2
    except Exception:
        pass
    return 1


def _choose_tile(N, tile_n, n_cores):
    """Pick (tile, N_pad): few fat steps; balanced even split on megacore
    chips; single tile on single-TC chips when the batch fits; tile capped so
    the activation footprint stays far under v5e's 16 MiB scoped VMEM."""
    N128 = _round_up(max(N, 1), 128)
    t = max(128, min(int(tile_n), 32768))
    t = (t // 128) * 128
    if N128 <= t:
        if n_cores >= 2 and N128 > 128:
            # Balanced split across the chip's TensorCores (v4/v5p/v7x).
            t = _round_up(_cdiv(N, n_cores), 128)
        else:
            # Single-TC chip (v5e/v6e): one big step, no extra step overhead.
            t = N128
    else:
        if n_cores >= 2:
            steps = _round_up(_cdiv(N128, t), n_cores)
            t = _round_up(_cdiv(N, steps), 128)
    n_pad = _round_up(N, t)
    return t, n_pad


def pinn_forward(x, y, lb, ub, weights, biases, *, tile_n=8192):
    """Pallas implementation of PhysicsInformedNN.forward (net_uv).

    x, y      : (N, 1) or (N,) float32 collocation coordinates
    lb, ub    : (2,)   float32 domain bounds for [x, y]
    weights   : 4 matrices for layers=[2, H, H, H, 2] (stored (in, out))
    biases    : 4 row-vectors (1, out_dim)
    Returns (u, v), each (N,) — matching `self.detach(u/v).squeeze()`.
    """
    assert len(weights) == 4 and len(biases) == 4
    x = jnp.asarray(x, jnp.float32).reshape(1, -1)        # layout-free (N,1)->(1,N)
    y = jnp.asarray(y, jnp.float32).reshape(1, -1)
    N = x.shape[1]
    H = weights[0].shape[1]

    # ---- fold coor_shift into layer 0 (exact affine rewrite) -----------------
    lb = jnp.asarray(lb, jnp.float32).reshape(2)
    ub = jnp.asarray(ub, jnp.float32).reshape(2)
    scale = 2.0 / (ub - lb)                                # X' = X*scale + shift
    shift = -2.0 * lb / (ub - lb) - 1.0

    W0 = jnp.asarray(weights[0], jnp.float32)              # (2, H)
    b0 = jnp.asarray(biases[0], jnp.float32).reshape(1, H)
    W0f = W0 * scale[:, None]
    b0f = (b0 + shift[None, :] @ W0).reshape(H)

    W1 = jnp.asarray(weights[1], jnp.float32)              # (H, H)
    W2 = jnp.asarray(weights[2], jnp.float32)              # (H, H)
    W3 = jnp.asarray(weights[3], jnp.float32)              # (H, 2)
    b1 = jnp.asarray(biases[1], jnp.float32).reshape(H)
    b2 = jnp.asarray(biases[2], jnp.float32).reshape(H)
    b3 = jnp.asarray(biases[3], jnp.float32).reshape(2)

    # Pack parameters into 3 constant-index blocks (one DMA each, VMEM-resident
    # across grid steps) instead of 8 tiny inputs.
    wmm = jnp.concatenate([W1.T, W2.T], axis=0)            # (2H, H) MXU weights
    cols = jnp.stack([b0f, b1, b2,
                      W0f[0, :], W0f[1, :],
                      W3[:, 0], W3[:, 1],
                      jnp.zeros((H,), jnp.float32)], axis=1)   # (H, 8)
    b3c = b3.reshape(2, 1)                                 # (2, 1)

    # ---- chip-aware batch tiling ---------------------------------------------
    n_cores = _num_tensorcores()
    tile, n_pad = _choose_tile(N, tile_n, n_cores)
    grid = (n_pad // tile,)

    if n_pad != N:   # padded tail columns compute garbage that is sliced off
        x = jnp.pad(x, ((0, 0), (0, n_pad - N)))
        y = jnp.pad(y, ((0, 0), (0, n_pad - N)))

    xy_spec = pl.BlockSpec((1, tile), lambda i: (0, i))

    def const(shape):
        # Same block every step -> no per-step re-DMA of the tiny parameters.
        return pl.BlockSpec(shape, lambda i: (0, 0))

    cost = pl.CostEstimate(
        flops=int(n_pad) * (4 * H * H + 12 * H),
        transcendentals=int(n_pad) * 3 * H,
        bytes_accessed=16 * int(n_pad) + 4 * (int(wmm.size) + int(cols.size) + 2),
    )

    compiler_kwargs = dict(dimension_semantics=("parallel",))
    if tile > 8192:
        # Large tiles can exceed v5e's 16 MiB default scoped VMEM; raise it.
        compiler_kwargs["vmem_limit_bytes"] = 64 * 1024 * 1024

    uv = pl.pallas_call(
        _pinn_mlp_kernel,
        out_shape=jax.ShapeDtypeStruct((2, n_pad), jnp.float32),
        grid_spec=pltpu.PrefetchScalarGridSpec(
            num_scalar_prefetch=0,
            grid=grid,
            in_specs=[xy_spec, xy_spec,
                      const((2 * H, H)), const((H, 8)), const((2, 1))],
            out_specs=pl.BlockSpec((2, tile), lambda i: (0, i)),   # lane-dense
        ),
        compiler_params=pltpu.CompilerParams(**compiler_kwargs),
        cost_estimate=cost,
    )(x, y, wmm, cols, b3c)

    return uv[0, :N], uv[1, :N]


# ----------------------------------------------------------------------------
# Deterministic parameter init (Xavier-normal weights, zero biases) + reference
# ----------------------------------------------------------------------------
def init_params(layers, key):
    weights, biases = [], []
    for l in range(len(layers) - 1):
        fan_in, fan_out = layers[l], layers[l + 1]
        key, sub = jax.random.split(key)
        std = jnp.sqrt(2.0 / (fan_in + fan_out))          # xavier_normal_
        W = std * jax.random.normal(sub, (fan_in, fan_out), dtype=jnp.float32)
        b = jnp.zeros((1, fan_out), dtype=jnp.float32)
        weights.append(W)
        biases.append(b)
    return weights, biases


def reference_forward(x, y, lb, ub, weights, biases):
    X = jnp.concatenate([x, y], axis=1)
    X = 2.0 * (X - lb.reshape(1, 2)) / (ub.reshape(1, 2) - lb.reshape(1, 2)) - 1.0
    for W, b in zip(weights[:-1], biases[:-1]):
        X = jnp.tanh(X @ W + b)
    Y = X @ weights[-1] + biases[-1]
    return jnp.squeeze(Y[:, 0:1]), jnp.squeeze(Y[:, 1:2])


if __name__ == "__main__":
    key = jax.random.PRNGKey(0)

    # layers = [2, H, H, H, 2]  (input (x, y) -> two-group flux output (u, v))
    H = 32
    layers = [2, H, H, H, 2]

    kw, kx1, ky1, kx2, ky2 = jax.random.split(key, 5)
    weights, biases = init_params(layers, kw)
    # Non-zero biases so every fold/bias path is actually exercised.
    biases = [b + 0.05 * (i + 1) for i, b in enumerate(biases)]

    # Domain bounds (reactor geometry: x, y in [0, 170]).
    lb = jnp.array([0.0, 0.0], dtype=jnp.float32)
    ub = jnp.array([170.0, 170.0], dtype=jnp.float32)

    # Case 1: N not a multiple of 128 (pad path; single / balanced-dual tile).
    N1 = 300
    x1 = jax.random.uniform(kx1, (N1, 1), jnp.float32, 0.0, 170.0)
    y1 = jax.random.uniform(ky1, (N1, 1), jnp.float32, 0.0, 170.0)
    u1, v1 = pinn_forward(x1, y1, lb, ub, weights, biases)
    u1, v1 = jax.block_until_ready(u1), jax.block_until_ready(v1)
    u1r, v1r = reference_forward(x1, y1, lb, ub, weights, biases)
    assert u1.shape == (N1,) and v1.shape == (N1,)
    assert jnp.allclose(u1, u1r, atol=1e-4, rtol=1e-4), float(jnp.max(jnp.abs(u1 - u1r)))
    assert jnp.allclose(v1, v1r, atol=1e-4, rtol=1e-4), float(jnp.max(jnp.abs(v1 - v1r)))

    # Case 2: multi-step grid (small tile forces several batch tiles).
    N2 = 1000
    x2 = jax.random.uniform(kx2, (N2, 1), jnp.float32, 0.0, 170.0)
    y2 = jax.random.uniform(ky2, (N2, 1), jnp.float32, 0.0, 170.0)
    u2, v2 = pinn_forward(x2, y2, lb, ub, weights, biases, tile_n=256)
    u2, v2 = jax.block_until_ready(u2), jax.block_until_ready(v2)
    u2r, v2r = reference_forward(x2, y2, lb, ub, weights, biases)
    assert u2.shape == (N2,) and v2.shape == (N2,)
    assert jnp.allclose(u2, u2r, atol=1e-4, rtol=1e-4), float(jnp.max(jnp.abs(u2 - u2r)))
    assert jnp.allclose(v2, v2r, atol=1e-4, rtol=1e-4), float(jnp.max(jnp.abs(v2 - v2r)))

    # TODO(synk): autograd-based PDE residual / boundary losses (grad_uv,
    # grad_2_uv, loss_*) and the optimizers are training-time machinery, not
    # part of forward(); not kernelized.
    print("KERNEL_OK")
</pallas_src>

<mosaic_0001>
module attributes {stable_mosaic.version = 11 : i64} {
  func.func @_pinn_mlp_kernel(%arg0: i32, %arg1: memref<1x384xf32, #tpu.memory_space<vmem>>, %arg2: memref<1x384xf32, #tpu.memory_space<vmem>>, %arg3: memref<64x32xf32, #tpu.memory_space<vmem>>, %arg4: memref<32x8xf32, #tpu.memory_space<vmem>>, %arg5: memref<2x1xf32, #tpu.memory_space<vmem>>, %arg6: memref<2x384xf32, #tpu.memory_space<vmem>>) attributes {dimension_semantics = [#tpu.dimension_semantics<parallel>], iteration_bounds = array<i64: 1>, scalar_prefetch = 0 : i64, scratch_operands = 0 : i64, tpu.core_type = #tpu.core_type<tc>, window_params = [{transform_indices = @transform_0, window_bounds = array<i64: 1, 384>}, {transform_indices = @transform_1, window_bounds = array<i64: 1, 384>}, {pipeline_mode = #tpu.pipeline_mode<synchronous>, transform_indices = @transform_2, window_bounds = array<i64: 64, 32>}, {pipeline_mode = #tpu.pipeline_mode<synchronous>, transform_indices = @transform_3, window_bounds = array<i64: 32, 8>}, {pipeline_mode = #tpu.pipeline_mode<synchronous>, transform_indices = @transform_4, window_bounds = array<i64: 2, 1>}, {transform_indices = @transform_5, window_bounds = array<i64: 2, 384>}]} {
    %c0 = arith.constant 0 : index
    %c0_0 = arith.constant 0 : index
    %0 = vector.load %arg1[%c0, %c0_0] : memref<1x384xf32, #tpu.memory_space<vmem>>, vector<1x384xf32>
    %c0_1 = arith.constant 0 : index
    %c0_2 = arith.constant 0 : index
    %1 = vector.load %arg2[%c0_1, %c0_2] : memref<1x384xf32, #tpu.memory_space<vmem>>, vector<1x384xf32>
    %c0_3 = arith.constant 0 : index
    %c0_4 = arith.constant 0 : index
    %2 = vector.load %arg4[%c0_3, %c0_4] : memref<32x8xf32, #tpu.memory_space<vmem>>, vector<32x8xf32>
    %c0_5 = arith.constant 0 : index
    %c0_6 = arith.constant 0 : index
    %3 = vector.load %arg3[%c0_5, %c0_6] : memref<64x32xf32, #tpu.memory_space<vmem>>, vector<64x32xf32>
    %4 = vector.extract_strided_slice %2 {offsets = [0, 0], sizes = [32, 1], strides = [1, 1]} : vector<32x8xf32> to vector<32x1xf32>
    %5 = vector.extract_strided_slice %2 {offsets = [0, 1], sizes = [32, 1], strides = [1, 1]} : vector<32x8xf32> to vector<32x1xf32>
    %6 = vector.extract_strided_slice %2 {offsets = [0, 2], sizes = [32, 1], strides = [1, 1]} : vector<32x8xf32> to vector<32x1xf32>
    %7 = vector.extract_strided_slice %2 {offsets = [0, 3], sizes = [32, 1], strides = [1, 1]} : vector<32x8xf32> to vector<32x1xf32>
    %8 = vector.extract_strided_slice %2 {offsets = [0, 4], sizes = [32, 1], strides = [1, 1]} : vector<32x8xf32> to vector<32x1xf32>
    %9 = vector.extract_strided_slice %2 {offsets = [0, 5], sizes = [32, 1], strides = [1, 1]} : vector<32x8xf32> to vector<32x1xf32>
    %10 = vector.extract_strided_slice %2 {offsets = [0, 6], sizes = [32, 1], strides = [1, 1]} : vector<32x8xf32> to vector<32x1xf32>
    %11 = vector.broadcast %7 : vector<32x1xf32> to vector<32x384xf32>
    %12 = vector.broadcast %0 : vector<1x384xf32> to vector<32x384xf32>
    %13 = arith.mulf %11, %12 : vector<32x384xf32>
    %14 = vector.broadcast %8 : vector<32x1xf32> to vector<32x384xf32>
    %15 = vector.broadcast %1 : vector<1x384xf32> to vector<32x384xf32>
    %16 = arith.mulf %14, %15 : vector<32x384xf32>
    %17 = arith.addf %13, %16 : vector<32x384xf32>
    %18 = vector.broadcast %4 : vector<32x1xf32> to vector<32x384xf32>
    %19 = arith.addf %17, %18 : vector<32x384xf32>
    %20 = math.tanh %19 : vector<32x384xf32>
    %21 = vector.extract_strided_slice %3 {offsets = [0, 0], sizes = [32, 32], strides = [1, 1]} : vector<64x32xf32> to vector<32x32xf32>
    %cst = arith.constant dense<0.000000e+00> : vector<32x384xf32>
    %22 = tpu.matmul %21, %20, %cst {dimension_numbers = #tpu.dot_dimension_numbers<[1], [0], [0], [1], [0, 0, 1, 1], [], []>} : vector<32x32xf32>, vector<32x384xf32>, vector<32x384xf32> -> vector<32x384xf32>
    %23 = vector.broadcast %5 : vector<32x1xf32> to vector<32x384xf32>
    %24 = arith.addf %22, %23 : vector<32x384xf32>
    %25 = math.tanh %24 : vector<32x384xf32>
    %26 = vector.extract_strided_slice %3 {offsets = [32, 0], sizes = [32, 32], strides = [1, 1]} : vector<64x32xf32> to vector<32x32xf32>
    %cst_7 = arith.constant dense<0.000000e+00> : vector<32x384xf32>
    %27 = tpu.matmul %26, %25, %cst_7 {dimension_numbers = #tpu.dot_dimension_numbers<[1], [0], [0], [1], [0, 0, 1, 1], [], []>} : vector<32x32xf32>, vector<32x384xf32>, vector<32x384xf32> -> vector<32x384xf32>
    %28 = vector.broadcast %6 : vector<32x1xf32> to vector<32x384xf32>
    %29 = arith.addf %27, %28 : vector<32x384xf32>
    %30 = math.tanh %29 : vector<32x384xf32>
    %31 = vector.broadcast %9 : vector<32x1xf32> to vector<32x384xf32>
    %32 = arith.mulf %31, %30 : vector<32x384xf32>
    %cst_8 = arith.constant dense<0.000000e+00> : vector<384xf32>
    %33 = vector.multi_reduction <add>, %32, %cst_8 [0] : vector<32x384xf32> to vector<384xf32>
    %34 = vector.shape_cast %33 : vector<384xf32> to vector<1x384xf32>
    %35 = vector.broadcast %10 : vector<32x1xf32> to vector<32x384xf32>
    %36 = arith.mulf %35, %30 : vector<32x384xf32>
    %cst_9 = arith.constant dense<0.000000e+00> : vector<384xf32>
    %37 = vector.multi_reduction <add>, %36, %cst_9 [0] : vector<32x384xf32> to vector<384xf32>
    %38 = vector.shape_cast %37 : vector<384xf32> to vector<1x384xf32>
    %39 = tpu.concatenate %34, %38 in 0 : vector<1x384xf32>, vector<1x384xf32> -> vector<2x384xf32>
    %c0_10 = arith.constant 0 : index
    %c0_11 = arith.constant 0 : index
    %40 = vector.load %arg5[%c0_10, %c0_11] : memref<2x1xf32, #tpu.memory_space<vmem>>, vector<2x1xf32>
    %41 = vector.broadcast %40 : vector<2x1xf32> to vector<2x384xf32>
    %42 = arith.addf %39, %41 : vector<2x384xf32>
    %c0_12 = arith.constant 0 : index
    %c0_13 = arith.constant 0 : index
    %43 = vector.load %arg6[%c0_12, %c0_13] : memref<2x384xf32, #tpu.memory_space<vmem>>, vector<2x384xf32>
    tpu.vector_store %arg6[%c0_12, %c0_13], %42 {strides = array<i32>} : memref<2x384xf32, #tpu.memory_space<vmem>>, vector<2x384xf32>,
    return
  }
  func.func @transform_0(%arg0: i32) -> (i32, i32) {
    %c0_i32 = arith.constant 0 : i32
    %c0_i32_0 = arith.constant 0 : i32
    return %c0_i32, %arg0 : i32, i32
  }
  func.func @transform_1(%arg0: i32) -> (i32, i32) {
    %c0_i32 = arith.constant 0 : i32
    %c0_i32_0 = arith.constant 0 : i32
    return %c0_i32, %arg0 : i32, i32
  }
  func.func @transform_2(%arg0: i32) -> (i32, i32) {
    %c0_i32 = arith.constant 0 : i32
    %c0_i32_0 = arith.constant 0 : i32
    %c0_i32_1 = arith.constant 0 : i32
    return %c0_i32, %c0_i32_0 : i32, i32
  }
  func.func @transform_3(%arg0: i32) -> (i32, i32) {
    %c0_i32 = arith.constant 0 : i32
    %c0_i32_0 = arith.constant 0 : i32
    %c0_i32_1 = arith.constant 0 : i32
    return %c0_i32, %c0_i32_0 : i32, i32
  }
  func.func @transform_4(%arg0: i32) -> (i32, i32) {
    %c0_i32 = arith.constant 0 : i32
    %c0_i32_0 = arith.constant 0 : i32
    %c0_i32_1 = arith.constant 0 : i32
    return %c0_i32, %c0_i32_0 : i32, i32
  }
  func.func @transform_5(%arg0: i32) -> (i32, i32) {
    %c0_i32 = arith.constant 0 : i32
    %c0_i32_0 = arith.constant 0 : i32
    return %c0_i32, %arg0 : i32, i32
  }
}

</mosaic_0001>

<bundles_post_ra>
// kernel: tpu_custom_call.1
= control target key start
LH: loop header
LB: loop body
LE: loop exit
PB: predicated region body
PF: predicated region fallthrough
CT: control target
= control target key end

     0   :  { %v983_v1 = vmov 4   ;;  %v984_v2 = vmov 3   ;;  %s1181_s0 = inlined_call_operand.vmem [shape: f32[1,384], index: 0, kind: input, shape index: {}]   ;;  %s1182_s1 = inlined_call_operand.vmem [shape: f32[1,384], index: 1, kind: input, shape index: {}]   ;;  %s1183_s2 = inlined_call_operand.vmem [shape: f32[64,32], index: 2, kind: input, shape index: {}]   ;;  %s1184_s3 = inlined_call_operand.vmem [shape: f32[32,8], index: 3, kind: input, shape index: {}]   ;;  %s1185_s4 = inlined_call_operand.vmem [shape: f32[2,1], index: 4, kind: input, shape index: {}]   ;;  %s1186_s5 = inlined_call_operand.hbm [shape: f32[2,384], index: 5, kind: output, shape index: {}]  }
   0x1   :  { %v1026_v0 = vld [vmem:[%s1184_s3] sm:$0xff]  ;;  %869 = vset.pattern.permute.xlu1 %v983_v1  ;;  %868 = vset.pattern.permute.xlu0 %v984_v2 }
   0x2   :  { %84 = vperm.xlu1 %869, %v1026_v0   ;;  %37 = vperm.xlu0 %868, %v1026_v0  }
   0x3   :  { %10 = vsyncpa [#allocation3], 0  ;;  %v1033_v3 = vld [vmem:[%s1184_s3 + $0x8] sm:$0xff]  ;;  %v1040_v4 = vld [vmem:[%s1184_s3 + $0x10] sm:$0xff]  ;;  %v985_v6 = vmov 0   ;;  %vm195_vm0 = vcmask 261120   ;;  %v56_v10 = vlaneseq }
   0x4   :  { %v1045_v5 = vld [vmem:[%s1184_s3 + $0x18] sm:$0xff]  ;;  %v1060_v7 = vld [vmem:[%s1183_s2] sm:$0xff]  ;;  %v986_v8 = vmov 0.0   ;;  %v987_v9 = vmov 1   ;;  %vm718_vm1 = vcmask 1040384  }
   0x5   :  { %272 = vmatprep.mubr.f32.mxu0 %v986_v8  ;;  %806 = vmatprep.mubr.msk.f32.mxu1 %vm195_vm0, %v1060_v7  ;;  %v1069_v11 = vshrl.u32 %v56_v10, 7  ;;  %v22_v16 = vld [vmem:[%s1182_s1] sm:$0x7] }
   0x6   :  { %88 = vperm.xlu1 %869, %v1033_v3   ;;  %42 = vperm.xlu0 %868, %v1033_v3   ;;  %v21_v19 = vld [vmem:[%s1181_s0] sm:$0x7] }
   0x7   :  { %v58_v14 = vsub.s32 0, %v1069_v11  ;;  %v62_v15 = vsub.s32 1, %v1069_v11  ;;  %v66_v20 = vsub.s32 2, %v1069_v11 }
   0x9   :  { %v103_v21 = vrot.slane %v22_v16, %v58_v14  ;;  %v107_v22 = vrot.slane %v22_v16, %v62_v15  ;;  %v59_v23 = vrot.slane %v21_v19, %v58_v14  ;;  %v63_v24 = vrot.slane %v21_v19, %v62_v15 }
   0xa   :  { %870 = vset.pattern.permute.xlu1 %v984_v2  ;;  %47 = vperm.xlu0 %868, %v1040_v4   ;;  %v111_v27 = vrot.slane %v22_v16, %v66_v20  ;;  %v67_v28 = vrot.slane %v21_v19, %v66_v20 }
   0xb   :  { %52 = vperm.xlu1 %870, %v1045_v5  }
   0xe   :  { %871 = vset.pattern.permute.xlu0 %v983_v1 }
   0xf   :  { %872 = vset.pattern.permute.xlu1 %v983_v1  ;;  %92 = vperm.xlu0 %871, %v1040_v4  }
  0x10   :  { %96 = vperm.xlu1 %872, %v1045_v5  }
  0x13   :  { %874 = vset.pattern.permute.xlu0 %v985_v6 }
  0x14   :  { %873 = vset.pattern.permute.xlu1 %v985_v6  ;;  %144 = vperm.xlu0 %874, %v1033_v3  }
  0x15   :  { %140 = vperm.xlu1 %873, %v1026_v0  }
  0x18   :  { %875 = vset.pattern.permute.xlu0 %v987_v9 }
  0x19   :  { %148 = vperm.xlu1 %873, %v1040_v4   ;;  %180 = vperm.xlu0 %875, %v1026_v0  }
  0x1d   :  { %152 = vperm.xlu1 %873, %v1045_v5   ;;  %192 = vperm.xlu0 %875, %v1045_v5  }
  0x21   :  { %876 = vset.pattern.permute.xlu1 %v987_v9 }
  0x22   :  { %184 = vperm.xlu1 %876, %v1033_v3  }
  0x26   :  { %188 = vperm.xlu1 %876, %v1040_v4  }
  0x81   :  { %v85_v12 = vpop.permute.xlu1 %84  ;;  %v38_v13 = vpop.permute.xlu0 %37 }
  0x82   :  { %v115_v29 = vmul.f32 %v103_v21, %v85_v12  ;;  %v116_v30 = vmul.f32 %v107_v22, %v85_v12  ;;  %v71_v31 = vmul.f32 %v59_v23, %v38_v13  ;;  %v72_v32 = vmul.f32 %v63_v24, %v38_v13 }
  0x83   :  { %v117_v40 = vmul.f32 %v111_v27, %v85_v12  ;;  %v73_v41 = vmul.f32 %v67_v28, %v38_v13 }
  0x84   :  { %v127_v43 = vadd.f32 %v115_v29, %v71_v31  ;;  %v128_v47 = vadd.f32 %v116_v30, %v72_v32 }
  0x85   :  { %v89_v17 = vpop.permute.xlu1 %88  ;;  %v43_v18 = vpop.permute.xlu0 %42  ;;  %v129_v52 = vadd.f32 %v117_v40, %v73_v41 }
  0x86   :  { %v118_v33 = vmul.f32 %v103_v21, %v89_v17  ;;  %v119_v34 = vmul.f32 %v107_v22, %v89_v17  ;;  %v120_v35 = vmul.f32 %v111_v27, %v89_v17  ;;  %v74_v36 = vmul.f32 %v59_v23, %v43_v18 }
  0x87   :  { %v75_v37 = vmul.f32 %v63_v24, %v43_v18  ;;  %v76_v38 = vmul.f32 %v67_v28, %v43_v18 }
  0x88   :  { %v130_v44 = vadd.f32 %v118_v33, %v74_v36 }
  0x89   :  { %v48_v25 = vpop.permute.xlu0 %47  ;;  %v131_v45 = vadd.f32 %v119_v34, %v75_v37  ;;  %v132_v46 = vadd.f32 %v120_v35, %v76_v38 }
  0x8a   :  { %v53_v26 = vpop.permute.xlu1 %52  ;;  %v77_v48 = vmul.f32 %v59_v23, %v48_v25  ;;  %v78_v58 = vmul.f32 %v63_v24, %v48_v25  ;;  %v79_v59 = vmul.f32 %v67_v28, %v48_v25 }
  0x8b   :  { %v80_v12 = vmul.f32 %v59_v23, %v53_v26  ;;  %v81_v13 = vmul.f32 %v63_v24, %v53_v26  ;;  %v82_v16 = vmul.f32 %v67_v28, %v53_v26 }
  0x8e   :  { %v93_v39 = vpop.permute.xlu0 %92 }
  0x8f   :  { %v97_v42 = vpop.permute.xlu1 %96  ;;  %v121_v49 = vmul.f32 %v103_v21, %v93_v39  ;;  %v122_v50 = vmul.f32 %v107_v22, %v93_v39  ;;  %v123_v53 = vmul.f32 %v111_v27, %v93_v39 }
  0x90   :  { %v124_v60 = vmul.f32 %v103_v21, %v97_v42  ;;  %v125_v62 = vmul.f32 %v107_v22, %v97_v42  ;;  %v126_v63 = vmul.f32 %v111_v27, %v97_v42 }
  0x91   :  { %v133_v9 = vadd.f32 %v121_v49, %v77_v48  ;;  %v134_v10 = vadd.f32 %v122_v50, %v78_v58  ;;  %v135_v15 = vadd.f32 %v123_v53, %v79_v59  ;;  %v988_v48 = vmov 2  }
  0x92   :  { %v136_v20 = vadd.f32 %v124_v60, %v80_v12  ;;  %v137_v21 = vadd.f32 %v125_v62, %v81_v13  ;;  %v138_v22 = vadd.f32 %v126_v63, %v82_v16  ;;  %877 = vset.pattern.permute.xlu1 %v988_v48  ;;  %878 = vset.pattern.permute.xlu0 %v988_v48  ;;  %v989_v49 = vmov 6  }
  0x93   :  { %v145_v51 = vpop.permute.xlu0 %144  ;;  %395 = vperm.xlu1 %877, %v1026_v0   ;;  %399 = vperm.xlu0 %878, %v1033_v3   ;;  %v990_v50 = vmov 5  }
  0x94   :  { %v158_v54 = vadd.f32 %v145_v51, %v130_v44  ;;  %v159_v55 = vadd.f32 %v145_v51, %v131_v45  ;;  %v160_v56 = vadd.f32 %v145_v51, %v132_v46  ;;  %v141_v57 = vpop.permute.xlu1 %140  ;;  %v28_v45 = vld [vmem:[%s1183_s2 + $0x8] sm:$0xff]  ;;  %v29_v46 = vld [vmem:[%s1183_s2 + $0x10] sm:$0xff]  ;;  %v722_v51 = vld [vmem:[%s1185_s4] sm:$0x3] }
  0x95   :  { %v155_v61 = vadd.f32 %v141_v57, %v127_v43  ;;  %v156_v1 = vadd.f32 %v141_v57, %v128_v47  ;;  %v157_v2 = vadd.f32 %v141_v57, %v129_v52  ;;  %v30_v47 = vld [vmem:[%s1183_s2 + $0x18] sm:$0xff] }
  0x96   :  { %887 = vtanh.f32 %v158_v54 }
  0x97   :  { %889 = vtanh.f32 %v159_v55  ;;  %403 = vperm.xlu1 %877, %v1040_v4   ;;  %881 = vset.pattern.permute.xlu0 %v989_v49 }
  0x98   :  { %891 = vtanh.f32 %v160_v56  ;;  %v149_v14 = vpop.permute.xlu1 %148  ;;  %668 = vperm.xlu0 %881, %v1033_v3  }
  0x99   :  { %893 = vtanh.f32 %v155_v61  ;;  %v161_v17 = vadd.f32 %v149_v14, %v133_v9  ;;  %v162_v18 = vadd.f32 %v149_v14, %v134_v10  ;;  %v163_v19 = vadd.f32 %v149_v14, %v135_v15 }
  0x9a   :  { %895 = vtanh.f32 %v156_v1 }
  0x9b   :  { %897 = vtanh.f32 %v157_v2  ;;  %407 = vperm.xlu1 %877, %v1045_v5  }
  0x9c   :  { %899 = vtanh.f32 %v161_v17  ;;  %v153_v25 = vpop.permute.xlu1 %152  ;;  %882 = vset.pattern.permute.xlu0 %v990_v50 }
  0x9d   :  { %901 = vtanh.f32 %v162_v18  ;;  %v164_v27 = vadd.f32 %v153_v25, %v136_v20  ;;  %v165_v29 = vadd.f32 %v153_v25, %v137_v21  ;;  %v166_v23 = vadd.f32 %v153_v25, %v138_v22  ;;  %609 = vperm.xlu0 %882, %v1026_v0  }
  0x9e   :  { %903 = vtanh.f32 %v163_v19 }
  0x9f   :  { %905 = vtanh.f32 %v164_v27  ;;  %879 = vset.pattern.permute.xlu1 %v990_v50 }
  0xa0   :  { %v888_v24 = vpop.eup %887  ;;  %907 = vtanh.f32 %v165_v29  ;;  %613 = vperm.xlu1 %879, %v1033_v3   ;;  %v181_v3 = vpop.permute.xlu0 %180 }
  0xa1   :  { %v890_v26 = vpop.eup %889  ;;  %909 = vtanh.f32 %v166_v23  ;;  %621 = vperm.xlu0 %882, %v1045_v5   ;;  %v185_v52 = vpop.permute.xlu1 %184 }
  0xa2   :  { %v892_v28 = vpop.eup %891 }
  0xa3   :  { %v894_v30 = vpop.eup %893 }
  0xa4   :  { %v896_v31 = vpop.eup %895  ;;  %v828_v32 = vpack.c.bf16 %v888_v24, %v894_v30  ;;  %880 = vset.pattern.permute.xlu1 %v989_v49  ;;  %v193_v59 = vpop.permute.xlu0 %192 }
  0xa5   :  { %v898_v33 = vpop.eup %897  ;;  %v826_v34 = vpack.c.bf16 %v890_v26, %v896_v31  ;;  %664 = vperm.xlu1 %880, %v1026_v0   ;;  %886 = vset.pattern.permute.xlu0 %v985_v6  ;;  %v189_v60 = vpop.permute.xlu1 %188 }
  0xa6   :  { %v900_v35 = vpop.eup %899  ;;  %v834_v36 = vpack.c.bf16 %v892_v28, %v898_v33  ;;  %v32_v33 = vld [vmem:[%s1183_s2 + $0x28] sm:$0xff] }
  0xa7   :  { %v902_v37 = vpop.eup %901  ;;  %827 = vmatprep.subr.bf16.mxu0 %v826_v34 }
  0xa8   :  { %v904_v38 = vpop.eup %903  ;;  %835 = vmatprep.subr.bf16.mxu1 %v834_v36  ;;  %829 = vmatpush1.bf16.msra.mxu0 %v828_v32 }
  0xa9   :  { %v906_v39 = vpop.eup %905  ;;  %837 = vmatpush3.bf16.msra.mxu1 %v834_v36  ;;  %883 = vset.pattern.permute.xlu1 %v990_v50 }
  0xaa   :  { %v908_v40 = vpop.eup %907  ;;  %v832_v41 = vpack.c.bf16 %v906_v39, %v900_v35  ;;  %617 = vperm.xlu1 %883, %v1040_v4   ;;  %v33_v35 = vld [vmem:[%s1183_s2 + $0x30] sm:$0xff]  ;;  %v34_v39 = vld [vmem:[%s1183_s2 + $0x38] sm:$0xff] }
  0xab   :  { %v910_v42 = vpop.eup %909  ;;  %v830_v43 = vpack.c.bf16 %v908_v40, %v902_v37 }
  0xac   :  { %v838_v44 = vpack.c.bf16 %v910_v42, %v904_v38 }
  0xad   :  { %831 = vmatprep.subr.bf16.mxu0 %v830_v43 }
  0xae   :  { %839 = vmatprep.subr.bf16.mxu1 %v838_v44  ;;  %833 = vmatpush1.bf16.msra.mxu0 %v832_v41 }
  0xaf   :  { %841 = vmatpush3.bf16.msra.mxu1 %v838_v44  ;;  %884 = vset.pattern.permute.xlu1 %v989_v49 }
  0xb0   :  { %672 = vperm.xlu1 %884, %v1040_v4  }
  0xb1   :  { %766 = vmatmul.mubr.msk.f32.vlgmr.msra.gmra.mrb[0].mxu0 %vm195_vm0, %v1060_v7  ;;  %v1104_v7 = vld [vmem:[%s1183_s2 + $0x20] sm:$0xff]  ;;  %s992_s2 = smov [#allocation2]  }
  0xb2   :  { %807 = vmatmul.mubr.msk.f32.vlgmr.msra.gmra.mrb[0].mxu1 %vm195_vm0, %v28_v45  ;;  %278 = vmatprep.mubr.f32.mxu0 %v986_v8  ;;  %s758_s19 = sshll.u32 %s992_s2, 4  ;;  %s759_s19 = int_to_ptr.vmem [resolvable:$true] %s758_s19 }
  0xb3   :  { %809 = vmatprep.mubr.msk.f32.mxu1 %vm195_vm0, %v29_v46  ;;  %s959_s20 = scalar_lea.vmem %s759_s19, 96  ;;  %p964_p1 = scmp.lt.s32.totalorder %s759_s19, %s759_s19 }
  0xb4   :  { %676 = vperm.xlu1 %884, %v1045_v5   ;;  %p960_p0 = scmp.ne.s32.totalorder %s759_s19, %s959_s20  ;;  %p965_p2 = scmp.lt.s32.totalorder %s959_s20, %s959_s20 }
  0xb5   :  { %767 = vmatmul.mubr.msk.f32.gmra.mrb[2].mxu0 %vm195_vm0, %v28_v45 }
  0xb6   :  { %810 = vmatmul.mubr.msk.f32.gmra.mrb[2].mxu1 %vm195_vm0, %v30_v47  ;;  %284 = vmatprep.mubr.f32.mxu0 %v986_v8  ;;  %p966_p3 = por %p965_p2, %p964_p1 }
  0xb7   :  { %486 = vmatprep.mubr.f32.mxu1 %v986_v8 }
  0xb8   :  { %885 = vset.pattern.permute.xlu1 %v985_v6  ;;  %p967_p4 = pnand %p966_p3, %p960_p0 }
  0xb9   :  { %768 = vmatmul.mubr.msk.f32.gmra.mrb[4].mxu0 %vm195_vm0, %v29_v46  ;;  %725 = vperm.xlu1 %885, %v722_v51  }
  0xba   :  { %290 = vmatprep.mubr.f32.mxu0 %v986_v8 }
  0xbd   :  { %769 = vmatmul.mubr.msk.f32.gmra.mrb[6].mxu0 %vm195_vm0, %v30_v47 }
  0xbe   :  { %820 = vmatprep.mubr.msk.f32.mxu0 %vm195_vm0, %v1104_v7 }
 0x112   :  { %v396_v40 = vpop.permute.xlu1 %395  ;;  %v400_v44 = vpop.permute.xlu0 %399 }
 0x116   :  { %v404_v41 = vpop.permute.xlu1 %403 }
 0x11a   :  { %v408_v42 = vpop.permute.xlu1 %407 }
 0x11f   :  { %v1145_v43 = vpop.permute.xlu1 %613 }
 0x124   :  { %v1147_v45 = vpop.permute.xlu1 %664 }
 0x184   :  { %v274_v0 = vpop.f32.mrb[0].mxu0 }
 0x185   :  { %v275_v53 = vadd.f32 %v274_v0, %v181_v3  ;;  %v808_v54 = vpop.f32.mrb[0].mxu1  ;;  %v276_v55 = vpop.f32.mrb[1].mxu0 }
 0x186   :  { %v369_v56 = vadd.f32 %v808_v54, %v185_v52  ;;  %v277_v57 = vadd.f32 %v276_v55, %v181_v3  ;;  %v363_v58 = vpop.f32.mrb[1].mxu1  ;;  %v669_v0 = vpop.permute.xlu0 %668 }
 0x187   :  { %911 = vtanh.f32 %v275_v53  ;;  %v364_v4 = vadd.f32 %v363_v58, %v181_v3 }
 0x188   :  { %913 = vtanh.f32 %v369_v56  ;;  %v280_v5 = vpop.f32.mrb[2].mxu0 }
 0x189   :  { %915 = vtanh.f32 %v277_v57  ;;  %v281_v61 = vadd.f32 %v280_v5, %v185_v52  ;;  %v811_v62 = vpop.f32.mrb[2].mxu1  ;;  %v282_v6 = vpop.f32.mrb[3].mxu0 }
 0x18a   :  { %917 = vtanh.f32 %v364_v4  ;;  %v379_v63 = vadd.f32 %v811_v62, %v193_v59  ;;  %v283_v1 = vadd.f32 %v282_v6, %v185_v52  ;;  %v373_v2 = vpop.f32.mrb[3].mxu1 }
 0x18b   :  { %919 = vtanh.f32 %v281_v61  ;;  %v374_v9 = vadd.f32 %v373_v2, %v189_v60 }
 0x18c   :  { %921 = vtanh.f32 %v379_v63  ;;  %v286_v10 = vpop.f32.mrb[4].mxu0 }
 0x18d   :  { %923 = vtanh.f32 %v283_v1  ;;  %v287_v12 = vadd.f32 %v286_v10, %v189_v60  ;;  %v288_v13 = vpop.f32.mrb[5].mxu0 }
 0x18e   :  { %925 = vtanh.f32 %v374_v9  ;;  %v289_v14 = vadd.f32 %v288_v13, %v189_v60 }
 0x18f   :  { %927 = vtanh.f32 %v287_v12 }
 0x190   :  { %v292_v15 = vpop.f32.mrb[6].mxu0  ;;  %929 = vtanh.f32 %v289_v14 }
 0x191   :  { %v912_v16 = vpop.eup %911  ;;  %v293_v17 = vadd.f32 %v292_v15, %v193_v59  ;;  %v294_v18 = vpop.f32.mrb[7].mxu0 }
 0x192   :  { %v914_v19 = vpop.eup %913  ;;  %v295_v20 = vadd.f32 %v294_v18, %v193_v59  ;;  %v610_v59 = vpop.permute.xlu0 %609 }
 0x193   :  { %v916_v21 = vpop.eup %915  ;;  %931 = vtanh.f32 %v293_v17 }
 0x194   :  { %v918_v22 = vpop.eup %917  ;;  %933 = vtanh.f32 %v295_v20 }
 0x195   :  { %v920_v25 = vpop.eup %919  ;;  %v850_v27 = vpack.c.bf16 %v914_v19, %v918_v22 }
 0x196   :  { %v922_v29 = vpop.eup %921  ;;  %v844_v23 = vpack.c.bf16 %v920_v25, %v912_v16  ;;  %v622_v18 = vpop.permute.xlu0 %621 }
 0x197   :  { %v924_v24 = vpop.eup %923  ;;  %851 = vmatprep.subr.bf16.mxu0 %v850_v27 }
 0x198   :  { %v926_v26 = vpop.eup %925  ;;  %853 = vmatpush3.bf16.msra.mxu0 %v850_v27  ;;  %v842_v28 = vpack.c.bf16 %v924_v24, %v916_v21 }
 0x199   :  { %v854_v30 = vpack.c.bf16 %v922_v29, %v926_v26  ;;  %v928_v31 = vpop.eup %927 }
 0x19a   :  { %843 = vmatprep.subr.bf16.mxu1 %v842_v28  ;;  %v930_v32 = vpop.eup %929 }
 0x19b   :  { %855 = vmatprep.subr.bf16.mxu0 %v854_v30  ;;  %845 = vmatpush1.bf16.msra.mxu1 %v844_v23 }
 0x19c   :  { %857 = vmatpush3.bf16.msra.mxu0 %v854_v30 }
 0x19d   :  { %v932_v34 = vpop.eup %931 }
 0x19e   :  { %v934_v36 = vpop.eup %933  ;;  %v848_v37 = vpack.c.bf16 %v932_v34, %v928_v31 }
 0x19f   :  { %821 = vmatmul.mubr.msk.f32.vlgmr.msra.gmra.mrb[8].mxu0 %vm195_vm0, %v32_v33  ;;  %v846_v38 = vpack.c.bf16 %v934_v36, %v930_v32 }
 0x1a0   :  { %823 = vmatprep.mubr.msk.f32.mxu0 %vm195_vm0, %v33_v35 }
 0x1a1   :  { %847 = vmatprep.subr.bf16.mxu1 %v846_v38 }
 0x1a2   :  { %849 = vmatpush1.bf16.msra.mxu1 %v848_v37 }
 0x1a3   :  { %824 = vmatmul.mubr.msk.f32.gmra.mrb[10].mxu0 %vm195_vm0, %v34_v39 }
 0x1a5   :  { %774 = vmatmul.mubr.msk.f32.vlgmr.msra.gmra.mrb[4].mxu1 %vm195_vm0, %v1104_v7 }
 0x1a6   :  { %492 = vmatprep.mubr.f32.mxu1 %v986_v8 }
 0x1a9   :  { %775 = vmatmul.mubr.msk.f32.gmra.mrb[6].mxu1 %vm195_vm0, %v32_v33 }
 0x1aa   :  { %498 = vmatprep.mubr.f32.mxu1 %v986_v8 }
 0x1ad   :  { %776 = vmatmul.mubr.msk.f32.gmra.mrb[8].mxu1 %vm195_vm0, %v33_v35 }
 0x1ae   :  { %504 = vmatprep.mubr.f32.mxu1 %v986_v8  ;;  %v1149_v8 = vpop.permute.xlu1 %617 }
 0x1b1   :  { %777 = vmatmul.mubr.msk.f32.gmra.mrb[10].mxu1 %vm195_vm0, %v34_v39 }
 0x1b2   :  { %v1151_v58 = vpop.permute.xlu1 %672 }
 0x1b6   :  { %v677_v16 = vpop.permute.xlu1 %676 }
 0x272   :  { %v822_v46 = vpop.f32.mrb[8].mxu0 }
 0x273   :  { %v583_v47 = vadd.f32 %v822_v46, %v400_v44  ;;  %v577_v7 = vpop.f32.mrb[9].mxu0 }
 0x274   :  { %v578_v48 = vadd.f32 %v577_v7, %v396_v40 }
 0x275   :  { %935 = vtanh.f32 %v583_v47 }
 0x276   :  { %937 = vtanh.f32 %v578_v48  ;;  %v825_v49 = vpop.f32.mrb[10].mxu0 }
 0x277   :  { %v593_v50 = vadd.f32 %v825_v49, %v408_v42  ;;  %v587_v51 = vpop.f32.mrb[11].mxu0 }
 0x278   :  { %v588_v3 = vadd.f32 %v587_v51, %v404_v41  ;;  %v488_v52 = vpop.f32.mrb[4].mxu1 }
 0x279   :  { %939 = vtanh.f32 %v593_v50  ;;  %v489_v53 = vadd.f32 %v488_v52, %v396_v40  ;;  %v490_v54 = vpop.f32.mrb[5].mxu1 }
 0x27a   :  { %941 = vtanh.f32 %v588_v3  ;;  %v491_v55 = vadd.f32 %v490_v54, %v396_v40 }
 0x27b   :  { %943 = vtanh.f32 %v489_v53 }
 0x27c   :  { %v494_v56 = vpop.f32.mrb[6].mxu1  ;;  %945 = vtanh.f32 %v491_v55 }
 0x27d   :  { %v495_v57 = vadd.f32 %v494_v56, %v400_v44  ;;  %v496_v4 = vpop.f32.mrb[7].mxu1 }
 0x27e   :  { %v497_v5 = vadd.f32 %v496_v4, %v400_v44 }
 0x27f   :  { %v936_v60 = vpop.eup %935  ;;  %947 = vtanh.f32 %v495_v57 }
 0x280   :  { %v938_v61 = vpop.eup %937  ;;  %v684_v62 = vmul.f32 %v936_v60, %v669_v0  ;;  %v629_v6 = vmul.f32 %v936_v60, %v1145_v43  ;;  %949 = vtanh.f32 %v497_v5  ;;  %v500_v63 = vpop.f32.mrb[8].mxu1 }
 0x281   :  { %v681_v1 = vmul.f32 %v938_v61, %v1147_v45  ;;  %v626_v2 = vmul.f32 %v938_v61, %v610_v59  ;;  %v501_v9 = vadd.f32 %v500_v63, %v404_v41  ;;  %v502_v10 = vpop.f32.mrb[9].mxu1 }
 0x282   :  { %v503_v12 = vadd.f32 %v502_v10, %v404_v41 }
 0x283   :  { %v940_v13 = vpop.eup %939  ;;  %v709_v14 = vadd.f32 %v684_v62, %v681_v1  ;;  %v654_v15 = vadd.f32 %v629_v6, %v626_v2  ;;  %951 = vtanh.f32 %v501_v9 }
 0x284   :  { %v942_v17 = vpop.eup %941  ;;  %953 = vtanh.f32 %v503_v12  ;;  %v506_v19 = vpop.f32.mrb[10].mxu1  ;;  %v690_v26 = vmul.f32 %v940_v13, %v677_v16  ;;  %v635_v28 = vmul.f32 %v940_v13, %v622_v18 }
 0x285   :  { %v944_v20 = vpop.eup %943  ;;  %v632_v21 = vmul.f32 %v942_v17, %v1149_v8  ;;  %v687_v22 = vmul.f32 %v942_v17, %v1151_v58  ;;  %v507_v25 = vadd.f32 %v506_v19, %v408_v42  ;;  %v508_v27 = vpop.f32.mrb[11].mxu1 }
 0x286   :  { %v509_v29 = vadd.f32 %v508_v27, %v408_v42  ;;  %v946_v23 = vpop.eup %945  ;;  %v679_v31 = vmul.f32 %v944_v20, %v1147_v45  ;;  %v624_v33 = vmul.f32 %v944_v20, %v610_v59 }
 0x287   :  { %v710_v24 = vadd.f32 %v709_v14, %v687_v22  ;;  %v655_v30 = vadd.f32 %v654_v15, %v632_v21  ;;  %955 = vtanh.f32 %v507_v25  ;;  %v680_v37 = vmul.f32 %v946_v23, %v1147_v45 }
 0x288   :  { %957 = vtanh.f32 %v509_v29  ;;  %v625_v39 = vmul.f32 %v946_v23, %v610_v59 }
 0x289   :  { %v948_v32 = vpop.eup %947  ;;  %v711_v34 = vadd.f32 %v710_v24, %v690_v26  ;;  %v656_v35 = vadd.f32 %v655_v30, %v635_v28  ;;  %v991_v28 = vmov 1983009808  }
 0x28a   :  { %v950_v36 = vpop.eup %949  ;;  %v682_v38 = vmul.f32 %v948_v32, %v669_v0  ;;  %v627_v40 = vmul.f32 %v948_v32, %v1145_v43  ;;  %v736_v30 = vunpack.c.l.s4 %v991_v28 }
 0x28b   :  { %v628_v41 = vmul.f32 %v950_v36, %v1145_v43  ;;  %v683_v42 = vmul.f32 %v950_v36, %v669_v0  ;;  %v712_v44 = vrot.slane %v711_v34, 4  ;;  %v657_v46 = vrot.slane %v656_v35, 4 }
 0x28c   :  { %v691_v47 = vadd.f32 %v682_v38, %v679_v31  ;;  %v636_v7 = vadd.f32 %v627_v40, %v624_v33 }
 0x28d   :  { %v952_v48 = vpop.eup %951  ;;  %v645_v49 = vadd.f32 %v628_v41, %v625_v39  ;;  %v700_v50 = vadd.f32 %v683_v42, %v680_v37  ;;  %v713_v51 = vadd.f32 %v712_v44, %v711_v34  ;;  %v658_v3 = vadd.f32 %v657_v46, %v656_v35  ;;  %v726_v42 = vpop.permute.xlu1 %725 }
 0x28e   :  { %v954_v52 = vpop.eup %953  ;;  %v630_v53 = vmul.f32 %v952_v48, %v1149_v8  ;;  %v685_v45 = vmul.f32 %v952_v48, %v1151_v58  ;;  %v737_v39 = vunpack.c.0.s8 %v736_v30 }
 0x28f   :  { %v714_v54 = vrot.slane %v713_v51, 2  ;;  %v659_v55 = vrot.slane %v658_v3, 2  ;;  %v631_v56 = vmul.f32 %v954_v52, %v1149_v8  ;;  %v686_v43 = vmul.f32 %v954_v52, %v1151_v58 }
 0x290   :  { %v637_v0 = vadd.f32 %v636_v7, %v630_v53  ;;  %v692_v57 = vadd.f32 %v691_v47, %v685_v45 }
 0x291   :  { %v660_v4 = vadd.f32 %v659_v55, %v658_v3  ;;  %v646_v59 = vadd.f32 %v645_v49, %v631_v56  ;;  %v701_v5 = vadd.f32 %v700_v50, %v686_v43  ;;  %v715_v60 = vadd.f32 %v714_v54, %v713_v51  ;;  %v956_v61 = vpop.eup %955 }
 0x292   :  { %v958_v62 = vpop.eup %957  ;;  %v633_v6 = vmul.f32 %v956_v61, %v622_v18  ;;  %v688_v63 = vmul.f32 %v956_v61, %v677_v16  ;;  %v740_v49 = vsub.s32 %v737_v39, %v1069_v11 }
 0x293   :  { %v661_v1 = vrot.slane %v660_v4, 1  ;;  %v716_v2 = vrot.slane %v715_v60, 1  ;;  %v634_v9 = vmul.f32 %v958_v62, %v622_v18  ;;  %v689_v10 = vmul.f32 %v958_v62, %v677_v16 }
 0x294   :  { %v638_v12 = vadd.f32 %v637_v0, %v633_v6  ;;  %v693_v8 = vadd.f32 %v692_v57, %v688_v63 }
 0x295   :  { %v662_v13 = vadd.f32 %v661_v1, %v660_v4  ;;  %v717_v14 = vadd.f32 %v716_v2, %v715_v60  ;;  %v647_v58 = vadd.f32 %v646_v59, %v634_v9  ;;  %v702_v15 = vadd.f32 %v701_v5, %v689_v10 }
 0x296   :  { %v639_v17 = vrot.slane %v638_v12, 4  ;;  %v694_v19 = vrot.slane %v693_v8, 4 }
 0x297   :  { %v721_v20 = vsel %vm718_vm1, %v662_v13, %v717_v14  ;;  %v648_v21 = vrot.slane %v647_v58, 4  ;;  %v703_v22 = vrot.slane %v702_v15, 4 }
 0x298   :  { %v640_v25 = vadd.f32 %v639_v17, %v638_v12  ;;  %v695_v27 = vadd.f32 %v694_v19, %v693_v8  ;;  %v730_v51 = vadd.f32 %v726_v42, %v721_v20 }
 0x299   :  { %v649_v29 = vadd.f32 %v648_v21, %v647_v58  ;;  %v704_v23 = vadd.f32 %v703_v22, %v702_v15 }
 0x29a   :  { %v641_v24 = vrot.slane %v640_v25, 2  ;;  %v696_v18 = vrot.slane %v695_v27, 2  ;;  %v748_v52 = vrot.slane %v730_v51, %v740_v49 }
 0x29b   :  { %v650_v16 = vrot.slane %v649_v29, 2  ;;  %v705_v26 = vrot.slane %v704_v23, 2 }
 0x29c   :  { %v642_v31 = vadd.f32 %v641_v24, %v640_v25  ;;  %v697_v32 = vadd.f32 %v696_v18, %v695_v27 }
 0x29d   :  { %v651_v33 = vadd.f32 %v650_v16, %v649_v29  ;;  %v706_v34 = vadd.f32 %v705_v26, %v704_v23 }
 0x29e   :  { %v643_v35 = vrot.slane %v642_v31, 1  ;;  %v698_v36 = vrot.slane %v697_v32, 1 }
 0x29f   :  { %v652_v37 = vrot.slane %v651_v33, 1  ;;  %v707_v38 = vrot.slane %v706_v34, 1 }
 0x2a0   :  { %v644_v40 = vadd.f32 %v643_v35, %v642_v31  ;;  %v699_v41 = vadd.f32 %v698_v36, %v697_v32 }
 0x2a1   :  { %v653_v44 = vadd.f32 %v652_v37, %v651_v33  ;;  %v708_v46 = vadd.f32 %v707_v38, %v706_v34 }
 0x2a2   :  { %v719_v47 = vsel %vm718_vm1, %v644_v40, %v699_v41 }
 0x2a3   :  { %v720_v7 = vsel %vm718_vm1, %v653_v44, %v708_v46  ;;  %v728_v48 = vadd.f32 %v726_v42, %v719_v47 }
 0x2a4   :  { %v729_v50 = vadd.f32 %v726_v42, %v720_v7 }
 0x2a6   :  { %v734_v3 = vcombine.low %v728_v48, %v729_v50 }
 0x2a8   :  { %v741_v53 = vrot.slane %v734_v3, %v740_v49 }
 0x2aa   :  { %v749_v45 = vcombine.low %v741_v53, %v748_v52 }
 0x2ac   :  { %751 = vst [vmem:[#allocation2] sm:$0x3f] %v749_v45 }
 0x2ad   :  { %970 = shalt.err (!%p967_p4)
}
 0x2ae   :  { %s971_s23 = scalar_lea.hbm %s1186_s5, 96 }
 0x2af   :  { %p972_p5 = scmp.ne.s32.totalorder %s1186_s5, %s971_s23  ;;  %p975_p6 = scmp.lt.u32.totalorder %s971_s23, %s1186_s5 }
 0x2b1   :  { %p977_p7 = pnand %p975_p6, %p972_p5 }
 0x2b3   :  { %980 = shalt.err (!%p977_p7)
}
 0x2b4   :  { %761 = dma.vmem_to_hbm [thread:$0]  %s759_s19, 96, %s1186_s5, [#allocation3]  }
 0x2b5   :  { %981 = dma.done.wait [#allocation3], 96  }
 0x2b6   :  { %982 = vsyncadd [#allocation3], 4294967200 }
 0x2b7   :  { %765 = vsyncpa [#allocation3], 1 }

</bundles_post_ra>
